<compile_context>
chip_gen: v5e
topology: v5e:2x2
jax: 0.10.0
libtpu: 0.0.40
codegen_flags: <defaults>
</compile_context>

<pallas_src>
import jax
import jax.numpy as jnp
from jax.experimental import pallas as pl
from jax.experimental.pallas import tpu as pltpu


# --------------------------------------------------------------------------
# Sizing helpers
# --------------------------------------------------------------------------
def _round_up(x, m):
    return (x + m - 1) // m * m


def _physical_vmem_bytes():
    try:
        return int(pltpu.get_tpu_info().vmem_capacity_bytes)
    except Exception:
        return 64 * 1024 * 1024          # v7x-sized (smallest recent generation)


def _num_tensorcores():
    try:
        kind = (jax.devices()[0].device_kind or "").lower()
    except Exception:
        return 1
    return 2 if "v7" in kind else 1


def _vmem_budget():
    # Tile-sizing budget: quarter of physical VMEM, capped at 32 MiB.
    return min(_physical_vmem_bytes() // 4, 32 << 20)


def _vmem_limit_bytes(working_set):
    # Explicit scoped-VMEM limit: working set + ~30% headroom for compiler
    # temporaries, never below 32 MiB, never above 75% of physical VMEM.
    phys = _physical_vmem_bytes()
    limit = int(working_set * 1.3) + (2 << 20)
    return max(32 << 20, min(limit, int(phys * 0.75)))


def _batch_tile(batch, tm, cap):
    tm = min(tm, cap)
    tm = min(tm, _round_up(batch, 8))
    # Guarantee >=2 grid steps (>=4 on v7x's 2 TensorCores) so "parallel"
    # megacore sharding never leaves a core idle.
    min_steps = 2 * _num_tensorcores()
    tm = min(tm, _round_up(pl.cdiv(batch, min_steps), 8))
    return max(8, (int(tm) // 8) * 8)


def _plan_resident(batch, hp, lp, x_itemsize, o_itemsize):
    """Pick TM for the resident-weight kernel; None if weights don't fit."""
    budget = _vmem_budget()
    # Conservative: assume double-buffered weights (Buffered(1) only adds headroom).
    fixed = 2 * (hp * hp * 2 + hp * lp * 2) + (hp + lp) * 4
    per_row = (2 * hp * x_itemsize          # x tile, double buffered
               + hp * 2 + hp * 4 + hp * 2   # bf16(x), f32 h, bf16(h) temps
               + 2 * lp * o_itemsize        # out tile, double buffered
               + lp * 4)                    # f32 out temp
    avail = budget - fixed
    if avail < 8 * per_row:
        return None                         # resident weights too big -> hidden tiling
    tm = _batch_tile(batch, avail // per_row, cap=2048)
    return tm, _vmem_limit_bytes(fixed + tm * per_row)


def _plan_hidden_tiled(batch, hp, lp, x_itemsize, o_itemsize, hidden_block=None):
    """Pick (hidden chunk, TM) for the hidden-dim-tiled kernel."""
    budget = _vmem_budget()
    if hidden_block is not None and hp % hidden_block == 0 and hidden_block % 128 == 0:
        candidates = (hidden_block,)
    else:
        candidates = (1024, 512, 256, 128)
    for th in candidates:
        if hp % th:
            continue
        fixed = 2 * (hp * th * 2 + th * lp * 2) + th * 4 + lp * 4
        per_row = (2 * hp * x_itemsize        # x tile (resident across k)
                   + hp * 2                   # bf16(x)
                   + th * 4 + th * 2          # f32 h chunk, bf16(h) chunk
                   + lp * 4                   # f32 accumulator scratch
                   + 2 * lp * o_itemsize + lp * 4)
        avail = budget - fixed
        if avail < 8 * per_row:
            continue
        tm = _batch_tile(batch, avail // per_row, cap=1024)
        return th, tm, _vmem_limit_bytes(fixed + tm * per_row)
    # Last resort for extreme hidden sizes.
    return 128, 8, _vmem_limit_bytes(budget)


# --------------------------------------------------------------------------
# Kernels
# --------------------------------------------------------------------------
def _head_kernel(x_ref, w1_ref, b1_ref, w2_ref, b2_ref, o_ref):
    # x: [TM, Hp] (caller dtype), w1: [Hp, Hp] bf16, b1: [1, Hp] f32,
    # w2: [Hp, Lp] bf16, b2: [1, Lp] f32, o: [TM, Lp] (caller dtype)
    x = x_ref[...].astype(jnp.bfloat16)          # cast hides under MXU slack
    h = jnp.dot(x, w1_ref[...], preferred_element_type=jnp.float32) + b1_ref[...]
    h = jnp.tanh(h)                              # EUP slot
    out = jnp.dot(h.astype(w2_ref.dtype), w2_ref[...],
                  preferred_element_type=jnp.float32) + b2_ref[...]
    o_ref[...] = out.astype(o_ref.dtype)


def _head_kernel_hidden_tiled(x_ref, w1_ref, b1_ref, w2_ref, b2_ref, o_ref, acc_ref):
    # Tile the hidden dim: x [TM, Hp] resident, W1 column chunk [Hp, TH],
    # W2 row chunk [TH, Lp]; accumulate the second matmul in f32 scratch.
    k = pl.program_id(1)

    @pl.when(k == 0)
    def _():
        acc_ref[...] = jnp.zeros_like(acc_ref)

    x = x_ref[...].astype(jnp.bfloat16)
    h = jnp.dot(x, w1_ref[...], preferred_element_type=jnp.float32) + b1_ref[...]
    h = jnp.tanh(h)
    acc_ref[...] += jnp.dot(h.astype(w2_ref.dtype), w2_ref[...],
                            preferred_element_type=jnp.float32)

    @pl.when(k == pl.num_programs(1) - 1)
    def _():
        o_ref[...] = (acc_ref[...] + b2_ref[...]).astype(o_ref.dtype)


# --------------------------------------------------------------------------
# pallas_call wrappers
# --------------------------------------------------------------------------
def _cost(batch, hp, lp, x_bytes, o_bytes):
    return pl.CostEstimate(
        flops=2 * batch * hp * (hp + lp),
        transcendentals=batch * hp,
        bytes_accessed=(batch * hp * x_bytes + hp * hp * 2 + hp * lp * 2
                        + (hp + lp) * 4 + batch * lp * o_bytes),
    )


def _run_resident(x, w1p, b1p, w2p, b2p, out_dtype, batch, hp, lp, tm, vmem_limit):
    grid = (pl.cdiv(batch, tm),)
    x_bytes = jnp.dtype(x.dtype).itemsize
    o_bytes = jnp.dtype(out_dtype).itemsize
    cost = _cost(batch, hp, lp, x_bytes, o_bytes)

    def call(single_buffer_weights):
        if single_buffer_weights:
            # Constant index map -> no second pipeline buffer (saves ~2.25 MiB
            # at H=1024; matters most inside v7x's 64 MiB per-TC VMEM).
            def wspec(shape):
                return pl.BlockSpec(shape, lambda i: (0, 0),
                                    pipeline_mode=pl.Buffered(1))
        else:
            def wspec(shape):
                return pl.BlockSpec(shape, lambda i: (0, 0))
        return pl.pallas_call(
            _head_kernel,
            out_shape=jax.ShapeDtypeStruct((batch, lp), out_dtype),
            grid=grid,
            in_specs=[
                pl.BlockSpec((tm, hp), lambda i: (i, 0)),   # x tile moves
                wspec((hp, hp)),                            # W1 resident
                wspec((1, hp)),                             # b1 resident
                wspec((hp, lp)),                            # W2 resident
                wspec((1, lp)),                             # b2 resident
            ],
            out_specs=pl.BlockSpec((tm, lp), lambda i: (i, 0)),
            compiler_params=pltpu.CompilerParams(
                dimension_semantics=("parallel",),
                vmem_limit_bytes=vmem_limit),
            cost_estimate=cost,
        )(x, w1p, b1p, w2p, b2p)

    try:
        return call(True)
    except Exception:
        # Fallback for Pallas versions without BlockSpec pipeline_mode.
        return call(False)


def _run_hidden_tiled(x, w1p, b1p, w2p, b2p, out_dtype, batch, hp, lp, th, tm, vmem_limit):
    grid = (pl.cdiv(batch, tm), hp // th)
    x_bytes = jnp.dtype(x.dtype).itemsize
    o_bytes = jnp.dtype(out_dtype).itemsize
    return pl.pallas_call(
        _head_kernel_hidden_tiled,
        out_shape=jax.ShapeDtypeStruct((batch, lp), out_dtype),
        grid=grid,
        in_specs=[
            pl.BlockSpec((tm, hp), lambda i, k: (i, 0)),    # x resident across k
            pl.BlockSpec((hp, th), lambda i, k: (0, k)),    # W1 column chunk
            pl.BlockSpec((1, th), lambda i, k: (0, k)),     # b1 chunk
            pl.BlockSpec((th, lp), lambda i, k: (k, 0)),    # W2 row chunk
            pl.BlockSpec((1, lp), lambda i, k: (0, 0)),     # b2 resident
        ],
        out_specs=pl.BlockSpec((tm, lp), lambda i, k: (i, 0)),
        scratch_shapes=[pltpu.VMEM((tm, lp), jnp.float32)],
        compiler_params=pltpu.CompilerParams(
            dimension_semantics=("parallel", "arbitrary"),
            vmem_limit_bytes=vmem_limit),
        cost_estimate=_cost(batch, hp, lp, x_bytes, o_bytes),
    )(x, w1p, b1p, w2p, b2p)


# --------------------------------------------------------------------------
# Public API
# --------------------------------------------------------------------------
def prepare_head_params(w_dense, b_dense, w_out, b_out):
    """Pad + cast parameters once (hoisted out of the per-call path).

    w_dense: [H, H] and w_out: [H, L] in x @ W layout (transpose of the
    PyTorch nn.Linear `weight`); biases are [H] / [L].
    """
    H = w_dense.shape[0]
    L = w_out.shape[1]
    Hp = _round_up(H, 128)
    Lp = _round_up(L, 128)

    w1 = w_dense.astype(jnp.bfloat16)
    w2 = w_out.astype(jnp.bfloat16)
    b1 = b_dense.astype(jnp.float32).reshape(1, H)
    b2 = b_out.astype(jnp.float32).reshape(1, L)
    if Hp != H or Lp != L:
        w1 = jnp.zeros((Hp, Hp), jnp.bfloat16).at[:H, :H].set(w1)
        w2 = jnp.zeros((Hp, Lp), jnp.bfloat16).at[:H, :L].set(w2)
        b1 = jnp.zeros((1, Hp), jnp.float32).at[:, :H].set(b1)
        b2 = jnp.zeros((1, Lp), jnp.float32).at[:, :L].set(b2)
    return (w1, b1, w2, b2, H, L)


def model_head_apply(features, params, *, hidden_block=None):
    """features: [B, H]  ->  logits [B, L] in features.dtype."""
    w1p, b1p, w2p, b2p, H, L = params
    B = features.shape[0]
    assert features.shape[1] == H, (features.shape, H)
    Hp = w1p.shape[0]
    Lp = w2p.shape[1]
    out_dtype = features.dtype

    # Dropout (eval) is identity. Hidden dim is only padded when not already
    # lane-aligned (real Wav2Vec2 sizes 768/1024 skip this copy entirely);
    # batch remainder is handled by the pl.cdiv grid, never padded.
    x = features if Hp == H else jnp.pad(features, ((0, 0), (0, Hp - H)))

    x_bytes = jnp.dtype(x.dtype).itemsize
    o_bytes = jnp.dtype(out_dtype).itemsize

    plan = None if hidden_block is not None else _plan_resident(B, Hp, Lp, x_bytes, o_bytes)
    if plan is not None:
        tm, vmem_limit = plan
        out = _run_resident(x, w1p, b1p, w2p, b2p, out_dtype, B, Hp, Lp, tm, vmem_limit)
    else:
        th, tm, vmem_limit = _plan_hidden_tiled(B, Hp, Lp, x_bytes, o_bytes, hidden_block)
        out = _run_hidden_tiled(x, w1p, b1p, w2p, b2p, out_dtype, B, Hp, Lp, th, tm, vmem_limit)

    return out if Lp == L else out[:, :L]


def model_head_forward(features, w_dense, b_dense, w_out, b_out, *, hidden_block=None):
    """One-shot convenience wrapper (prepare + apply)."""
    return model_head_apply(features,
                            prepare_head_params(w_dense, b_dense, w_out, b_out),
                            hidden_block=hidden_block)


# --------------------------------------------------------------------------
# Self-test
# --------------------------------------------------------------------------
if __name__ == "__main__":
    key = jax.random.PRNGKey(0)
    ks = jax.random.split(key, 10)

    # --- Case 1: module-consistent small shapes (resident-weight path). ---
    B, H, L = 8, 32, 8
    features = jax.random.normal(ks[0], (B, H), dtype=jnp.float32)
    # PyTorch Linear computes x @ W.T + b with W: [out, in]; weights here are
    # stored pre-transposed to [in, out] so the kernel does x @ W.
    w_dense = jax.random.normal(ks[1], (H, H), dtype=jnp.float32) / jnp.sqrt(H)
    b_dense = jax.random.normal(ks[2], (H,), dtype=jnp.float32) * 0.01
    w_out = jax.random.normal(ks[3], (H, L), dtype=jnp.float32) / jnp.sqrt(H)
    b_out = jax.random.normal(ks[4], (L,), dtype=jnp.float32) * 0.01

    params = prepare_head_params(w_dense, b_dense, w_out, b_out)
    out = jax.block_until_ready(model_head_apply(features, params))
    ref = jnp.tanh(features @ w_dense + b_dense) @ w_out + b_out
    assert out.shape == (B, L) and out.dtype == features.dtype
    assert jnp.allclose(out, ref, atol=2e-2, rtol=2e-2), (
        float(jnp.max(jnp.abs(out - ref))))

    # --- Case 2: exercise the hidden-dim-tiled fallback at small scale by
    # forcing a 128-wide hidden chunk (same path used when H is too large for
    # resident weights, e.g. H >= 2048 on v7x). ---
    B2, H2, L2 = 16, 256, 8
    features2 = jax.random.normal(ks[5], (B2, H2), dtype=jnp.float32)
    w_dense2 = jax.random.normal(ks[6], (H2, H2), dtype=jnp.float32) / jnp.sqrt(H2)
    b_dense2 = jax.random.normal(ks[7], (H2,), dtype=jnp.float32) * 0.01
    w_out2 = jax.random.normal(ks[8], (H2, L2), dtype=jnp.float32) / jnp.sqrt(H2)
    b_out2 = jax.random.normal(ks[9], (L2,), dtype=jnp.float32) * 0.01

    out2 = jax.block_until_ready(
        model_head_forward(features2, w_dense2, b_dense2, w_out2, b_out2,
                           hidden_block=128))
    ref2 = jnp.tanh(features2 @ w_dense2 + b_dense2) @ w_out2 + b_out2
    assert out2.shape == (B2, L2)
    assert jnp.allclose(out2, ref2, atol=5e-2, rtol=5e-2), (
        float(jnp.max(jnp.abs(out2 - ref2))))

    print("KERNEL_OK")
</pallas_src>

<mosaic_0001>
module attributes {stable_mosaic.version = 11 : i64} {
  func.func @_head_kernel(%arg0: i32, %arg1: memref<8x128xf32, #tpu.memory_space<vmem>>, %arg2: memref<128x128xbf16, #tpu.memory_space<vmem>>, %arg3: memref<1x128xf32, #tpu.memory_space<vmem>>, %arg4: memref<128x128xbf16, #tpu.memory_space<vmem>>, %arg5: memref<1x128xf32, #tpu.memory_space<vmem>>, %arg6: memref<8x128xf32, #tpu.memory_space<vmem>>) attributes {dimension_semantics = [#tpu.dimension_semantics<parallel>], iteration_bounds = array<i64: 1>, scalar_prefetch = 0 : i64, scratch_operands = 0 : i64, tpu.core_type = #tpu.core_type<tc>, window_params = [{transform_indices = @transform_0, window_bounds = array<i64: 8, 128>}, {pipeline_mode = #tpu.pipeline_mode<synchronous>, transform_indices = @transform_1, window_bounds = array<i64: 128, 128>}, {pipeline_mode = #tpu.pipeline_mode<synchronous>, transform_indices = @transform_2, window_bounds = array<i64: 1, 128>}, {pipeline_mode = #tpu.pipeline_mode<synchronous>, transform_indices = @transform_3, window_bounds = array<i64: 128, 128>}, {pipeline_mode = #tpu.pipeline_mode<synchronous>, transform_indices = @transform_4, window_bounds = array<i64: 1, 128>}, {transform_indices = @transform_5, window_bounds = array<i64: 8, 128>}]} {
    %c0 = arith.constant 0 : index
    %c0_0 = arith.constant 0 : index
    %0 = vector.load %arg1[%c0, %c0_0] : memref<8x128xf32, #tpu.memory_space<vmem>>, vector<8x128xf32>
    %1 = arith.truncf %0 : vector<8x128xf32> to vector<8x128xbf16>
    %c0_1 = arith.constant 0 : index
    %c0_2 = arith.constant 0 : index
    %2 = vector.load %arg2[%c0_1, %c0_2] : memref<128x128xbf16, #tpu.memory_space<vmem>>, vector<128x128xbf16>
    %cst = arith.constant dense<0.000000e+00> : vector<8x128xf32>
    %3 = tpu.matmul %1, %2, %cst {dimension_numbers = #tpu.dot_dimension_numbers<[1], [0], [0], [1], [0, 0, 1, 1], [], []>} : vector<8x128xbf16>, vector<128x128xbf16>, vector<8x128xf32> -> vector<8x128xf32>
    %c0_3 = arith.constant 0 : index
    %c0_4 = arith.constant 0 : index
    %4 = vector.load %arg3[%c0_3, %c0_4] : memref<1x128xf32, #tpu.memory_space<vmem>>, vector<1x128xf32>
    %5 = vector.broadcast %4 : vector<1x128xf32> to vector<8x128xf32>
    %6 = arith.addf %3, %5 : vector<8x128xf32>
    %7 = math.tanh %6 : vector<8x128xf32>
    %8 = arith.truncf %7 : vector<8x128xf32> to vector<8x128xbf16>
    %c0_5 = arith.constant 0 : index
    %c0_6 = arith.constant 0 : index
    %9 = vector.load %arg4[%c0_5, %c0_6] : memref<128x128xbf16, #tpu.memory_space<vmem>>, vector<128x128xbf16>
    %cst_7 = arith.constant dense<0.000000e+00> : vector<8x128xf32>
    %10 = tpu.matmul %8, %9, %cst_7 {dimension_numbers = #tpu.dot_dimension_numbers<[1], [0], [0], [1], [0, 0, 1, 1], [], []>} : vector<8x128xbf16>, vector<128x128xbf16>, vector<8x128xf32> -> vector<8x128xf32>
    %c0_8 = arith.constant 0 : index
    %c0_9 = arith.constant 0 : index
    %11 = vector.load %arg5[%c0_8, %c0_9] : memref<1x128xf32, #tpu.memory_space<vmem>>, vector<1x128xf32>
    %12 = vector.broadcast %11 : vector<1x128xf32> to vector<8x128xf32>
    %13 = arith.addf %10, %12 : vector<8x128xf32>
    %c0_10 = arith.constant 0 : index
    %c0_11 = arith.constant 0 : index
    %14 = vector.load %arg6[%c0_10, %c0_11] : memref<8x128xf32, #tpu.memory_space<vmem>>, vector<8x128xf32>
    tpu.vector_store %arg6[%c0_10, %c0_11], %13 {strides = array<i32>} : memref<8x128xf32, #tpu.memory_space<vmem>>, vector<8x128xf32>,
    return
  }
  func.func @transform_0(%arg0: i32) -> (i32, i32) {
    %c0_i32 = arith.constant 0 : i32
    %c0_i32_0 = arith.constant 0 : i32
    return %arg0, %c0_i32 : i32, i32
  }
  func.func @transform_1(%arg0: i32) -> (i32, i32) {
    %c0_i32 = arith.constant 0 : i32
    %c0_i32_0 = arith.constant 0 : i32
    %c0_i32_1 = arith.constant 0 : i32
    return %c0_i32, %c0_i32_0 : i32, i32
  }
  func.func @transform_2(%arg0: i32) -> (i32, i32) {
    %c0_i32 = arith.constant 0 : i32
    %c0_i32_0 = arith.constant 0 : i32
    %c0_i32_1 = arith.constant 0 : i32
    return %c0_i32, %c0_i32_0 : i32, i32
  }
  func.func @transform_3(%arg0: i32) -> (i32, i32) {
    %c0_i32 = arith.constant 0 : i32
    %c0_i32_0 = arith.constant 0 : i32
    %c0_i32_1 = arith.constant 0 : i32
    return %c0_i32, %c0_i32_0 : i32, i32
  }
  func.func @transform_4(%arg0: i32) -> (i32, i32) {
    %c0_i32 = arith.constant 0 : i32
    %c0_i32_0 = arith.constant 0 : i32
    %c0_i32_1 = arith.constant 0 : i32
    return %c0_i32, %c0_i32_0 : i32, i32
  }
  func.func @transform_5(%arg0: i32) -> (i32, i32) {
    %c0_i32 = arith.constant 0 : i32
    %c0_i32_0 = arith.constant 0 : i32
    return %arg0, %c0_i32 : i32, i32
  }
}

module attributes {stable_mosaic.version = 11 : i64} {
  func.func @_head_kernel(%arg0: i32, %arg1: memref<8x128xf32, #tpu.memory_space<vmem>>, %arg2: memref<128x128xbf16, #tpu.memory_space<vmem>>, %arg3: memref<1x128xf32, #tpu.memory_space<vmem>>, %arg4: memref<128x128xbf16, #tpu.memory_space<vmem>>, %arg5: memref<1x128xf32, #tpu.memory_space<vmem>>, %arg6: memref<8x128xf32, #tpu.memory_space<vmem>>) attributes {dimension_semantics = [#tpu.dimension_semantics<parallel>], iteration_bounds = array<i64: 1>, scalar_prefetch = 0 : i64, scratch_operands = 0 : i64, tpu.core_type = #tpu.core_type<tc>, window_params = [{transform_indices = @transform_0, window_bounds = array<i64: 8, 128>}, {pipeline_mode = #tpu.pipeline_mode<synchronous>, transform_indices = @transform_1, window_bounds = array<i64: 128, 128>}, {pipeline_mode = #tpu.pipeline_mode<synchronous>, transform_indices = @transform_2, window_bounds = array<i64: 1, 128>}, {pipeline_mode = #tpu.pipeline_mode<synchronous>, transform_indices = @transform_3, window_bounds = array<i64: 128, 128>}, {pipeline_mode = #tpu.pipeline_mode<synchronous>, transform_indices = @transform_4, window_bounds = array<i64: 1, 128>}, {transform_indices = @transform_5, window_bounds = array<i64: 8, 128>}]} {
    %c0 = arith.constant 0 : index
    %c0_0 = arith.constant 0 : index
    %0 = vector.load %arg1[%c0, %c0_0] : memref<8x128xf32, #tpu.memory_space<vmem>>, vector<8x128xf32>
    %1 = arith.truncf %0 : vector<8x128xf32> to vector<8x128xbf16>
    %c0_1 = arith.constant 0 : index
    %c0_2 = arith.constant 0 : index
    %2 = vector.load %arg2[%c0_1, %c0_2] : memref<128x128xbf16, #tpu.memory_space<vmem>>, vector<128x128xbf16>
    %cst = arith.constant dense<0.000000e+00> : vector<8x128xf32>
    %3 = tpu.matmul %1, %2, %cst {dimension_numbers = #tpu.dot_dimension_numbers<[1], [0], [0], [1], [0, 0, 1, 1], [], []>} : vector<8x128xbf16>, vector<128x128xbf16>, vector<8x128xf32> -> vector<8x128xf32>
    %c0_3 = arith.constant 0 : index
    %c0_4 = arith.constant 0 : index
    %4 = vector.load %arg3[%c0_3, %c0_4] : memref<1x128xf32, #tpu.memory_space<vmem>>, vector<1x128xf32>
    %5 = vector.broadcast %4 : vector<1x128xf32> to vector<8x128xf32>
    %6 = arith.addf %3, %5 : vector<8x128xf32>
    %7 = math.tanh %6 : vector<8x128xf32>
    %8 = arith.truncf %7 : vector<8x128xf32> to vector<8x128xbf16>
    %c0_5 = arith.constant 0 : index
    %c0_6 = arith.constant 0 : index
    %9 = vector.load %arg4[%c0_5, %c0_6] : memref<128x128xbf16, #tpu.memory_space<vmem>>, vector<128x128xbf16>
    %cst_7 = arith.constant dense<0.000000e+00> : vector<8x128xf32>
    %10 = tpu.matmul %8, %9, %cst_7 {dimension_numbers = #tpu.dot_dimension_numbers<[1], [0], [0], [1], [0, 0, 1, 1], [], []>} : vector<8x128xbf16>, vector<128x128xbf16>, vector<8x128xf32> -> vector<8x128xf32>
    %c0_8 = arith.constant 0 : index
    %c0_9 = arith.constant 0 : index
    %11 = vector.load %arg5[%c0_8, %c0_9] : memref<1x128xf32, #tpu.memory_space<vmem>>, vector<1x128xf32>
    %12 = vector.broadcast %11 : vector<1x128xf32> to vector<8x128xf32>
    %13 = arith.addf %10, %12 : vector<8x128xf32>
    %c0_10 = arith.constant 0 : index
    %c0_11 = arith.constant 0 : index
    %14 = vector.load %arg6[%c0_10, %c0_11] : memref<8x128xf32, #tpu.memory_space<vmem>>, vector<8x128xf32>
    tpu.vector_store %arg6[%c0_10, %c0_11], %13 {strides = array<i32>} : memref<8x128xf32, #tpu.memory_space<vmem>>, vector<8x128xf32>,
    return
  }
  func.func @transform_0(%arg0: i32) -> (i32, i32) {
    %c0_i32 = arith.constant 0 : i32
    %c0_i32_0 = arith.constant 0 : i32
    return %arg0, %c0_i32 : i32, i32
  }
  func.func @transform_1(%arg0: i32) -> (i32, i32) {
    %c0_i32 = arith.constant 0 : i32
    %c0_i32_0 = arith.constant 0 : i32
    %c0_i32_1 = arith.constant 0 : i32
    return %c0_i32, %c0_i32_0 : i32, i32
  }
  func.func @transform_2(%arg0: i32) -> (i32, i32) {
    %c0_i32 = arith.constant 0 : i32
    %c0_i32_0 = arith.constant 0 : i32
    %c0_i32_1 = arith.constant 0 : i32
    return %c0_i32, %c0_i32_0 : i32, i32
  }
  func.func @transform_3(%arg0: i32) -> (i32, i32) {
    %c0_i32 = arith.constant 0 : i32
    %c0_i32_0 = arith.constant 0 : i32
    %c0_i32_1 = arith.constant 0 : i32
    return %c0_i32, %c0_i32_0 : i32, i32
  }
  func.func @transform_4(%arg0: i32) -> (i32, i32) {
    %c0_i32 = arith.constant 0 : i32
    %c0_i32_0 = arith.constant 0 : i32
    %c0_i32_1 = arith.constant 0 : i32
    return %c0_i32, %c0_i32_0 : i32, i32
  }
  func.func @transform_5(%arg0: i32) -> (i32, i32) {
    %c0_i32 = arith.constant 0 : i32
    %c0_i32_0 = arith.constant 0 : i32
    return %arg0, %c0_i32 : i32, i32
  }
}

</mosaic_0001>

<bundles_post_ra>
// kernel: tpu_custom_call.1
= control target key start
LH: loop header
LB: loop body
LE: loop exit
PB: predicated region body
PF: predicated region fallthrough
CT: control target
= control target key end

     0   :  { %10 = vsyncpa [#allocation3], 0  ;;  %s497_s0 = inlined_call_operand.hbm [shape: f32[8,128], index: 0, kind: input, shape index: {}]   ;;  %s498_s1 = inlined_call_operand.hbm [shape: bf16[128,128], index: 1, kind: input, shape index: {}]   ;;  %s499_s2 = inlined_call_operand.vmem [shape: f32[1,128], index: 2, kind: input, shape index: {}]   ;;  %s500_s3 = inlined_call_operand.hbm [shape: bf16[128,128], index: 3, kind: input, shape index: {}]   ;;  %s501_s4 = inlined_call_operand.vmem [shape: f32[1,128], index: 4, kind: input, shape index: {}]   ;;  %s502_s5 = inlined_call_operand.hbm [shape: f32[8,128], index: 5, kind: output, shape index: {}]  }
   0x1   :  { %11 = vsyncpa [#allocation6], 0  ;;  %s28_s20 = sshll.u32 %s498_s1, 4  ;;  %s29_s20 = int_to_ptr.hbm [resolvable:$true] %s28_s20 }
   0x2   :  { %12 = vsyncpa [#allocation4], 0  ;;  %s443_s21 = smov [#allocation5]   ;;  %s18_s25 = sshll.u32 %s497_s0, 4  ;;  %s19_s25 = int_to_ptr.hbm [resolvable:$true] %s18_s25 }
   0x3   :  { %s30_s22 = sshll.u32 %s443_s21, 4  ;;  %s444_s26 = smov 64   ;;  %s31_s22 = int_to_ptr.vmem [resolvable:$true] %s30_s22 }
   0x4   :  { %s445_s27 = smov 4   ;;  %s446_s28 = smov [#allocation2]  }
   0x5   :  { %36 = dma.hbm_to_vmem [thread:$0]  %s29_s20, 1024, %s31_s22, [#allocation6], %s444_s26, %s444_s26, %s445_s27  }
   0x6   :  { %s20_s29 = sshll.u32 %s446_s28, 4  ;;  %s43_s7 = sshll.u32 %s500_s3, 4  ;;  %s21_s29 = int_to_ptr.vmem [resolvable:$true] %s20_s29  ;;  %s44_s7 = int_to_ptr.hbm [resolvable:$true] %s43_s7 }
   0x7   :  { %23 = dma.hbm_to_vmem [thread:$0]  %s19_s25, 128, %s21_s29, [#allocation3]  }
   0x8   :  { %s447_s1 = smov [#allocation7]  }
   0x9   :  { %s45_s8 = sshll.u32 %s447_s1, 4  ;;  %s46_s8 = int_to_ptr.vmem [resolvable:$true] %s45_s8 }
   0xa   :  { %51 = dma.hbm_to_vmem [thread:$0]  %s44_s7, 1024, %s46_s8, [#allocation6], %s444_s26, %s444_s26, %s445_s27  }
   0xb   :  { %437 = dma.done.wait [#allocation3], 128  }
   0xc   :  { %438 = vsyncadd [#allocation3], 4294967168 }
   0xd   :  { %439 = dma.done.wait [#allocation6], 2048  }
   0xe   :  { %440 = vsyncadd [#allocation6], 4294965248  ;;  %v322_v0 = vld [vmem:[#allocation5 + $0x38] sm:$0xff]  ;;  %v321_v1 = vld [vmem:[#allocation5 + $0x30] sm:$0xff]  ;;  %s448_s11 = smov [#allocation8]   ;;  %s240_s15 = sshll.u32 %s502_s5, 4  ;;  %s241_s15 = int_to_ptr.hbm [resolvable:$true] %s240_s15 }
   0xf   :  { %136 = vmatpush.bf16.msra.mxu0 %v322_v0  ;;  %v330_v2 = vld [vmem:[#allocation7 + $0x38] sm:$0xff]  ;;  %v329_v3 = vld [vmem:[#allocation7 + $0x30] sm:$0xff]  ;;  %v320_v4 = vld [vmem:[#allocation5 + $0x28] sm:$0xff]  ;;  %s238_s12 = sshll.u32 %s448_s11, 4  ;;  %s239_s12 = int_to_ptr.vmem [resolvable:$true] %s238_s12 }
  0x10   :  { %219 = vmatpush.bf16.msra.mxu1 %v330_v2  ;;  %v328_v5 = vld [vmem:[#allocation7 + $0x28] sm:$0xff]  ;;  %v319_v6 = vld [vmem:[#allocation5 + $0x20] sm:$0xff]  ;;  %v318_v8 = vld [vmem:[#allocation5 + $0x18] sm:$0xff] }
  0x11   :  { %v327_v7 = vld [vmem:[#allocation7 + $0x20] sm:$0xff]  ;;  %v326_v9 = vld [vmem:[#allocation7 + $0x18] sm:$0xff]  ;;  %v317_v10 = vld [vmem:[#allocation5 + $0x10] sm:$0xff] }
  0x12   :  { %v316_v11 = vld [vmem:[#allocation5 + $0x8] sm:$0xff]  ;;  %v315_v12 = vld [vmem:[#allocation5] sm:$0xff]  ;;  %v66_v13 = vld [vmem:[#allocation2] sm:$0xff] }
  0x13   :  { %137 = vmatpush.bf16.msra.mxu0 %v321_v1  ;;  %v67_v14 = vpack.c.bf16 %v66_v13, %v66_v13  ;;  %v325_v15 = vld [vmem:[#allocation7 + $0x10] sm:$0xff]  ;;  %v324_v16 = vld [vmem:[#allocation7 + $0x8] sm:$0xff]  ;;  %v323_v17 = vld [vmem:[#allocation7] sm:$0xff] }
  0x14   :  { %220 = vmatpush.bf16.msra.mxu1 %v329_v3  ;;  %v337_v18 = vld [vmem:[%s499_s2] ss:$0 sm:$0xff] }
  0x15   :  { %v338_v24 = vld [vmem:[%s501_s4] ss:$0 sm:$0xff] }
  0x17   :  { %138 = vmatpush.bf16.msra.mxu0 %v320_v4 }
  0x18   :  { %221 = vmatpush.bf16.msra.mxu1 %v328_v5 }
  0x1b   :  { %139 = vmatpush.bf16.msra.mxu0 %v319_v6 }
  0x1c   :  { %222 = vmatpush.bf16.msra.mxu1 %v327_v7 }
  0x1f   :  { %140 = vmatpush.bf16.msra.mxu0 %v318_v8 }
  0x20   :  { %223 = vmatpush.bf16.msra.mxu1 %v326_v9 }
  0x23   :  { %141 = vmatpush.bf16.msra.mxu0 %v317_v10 }
  0x24   :  { %224 = vmatpush.bf16.msra.mxu1 %v325_v15 }
  0x27   :  { %142 = vmatpush.bf16.msra.mxu0 %v316_v11 }
  0x28   :  { %225 = vmatpush.bf16.msra.mxu1 %v324_v16 }
  0x2b   :  { %143 = vmatpush.bf16.msra.mxu0 %v315_v12 }
  0x2c   :  { %226 = vmatpush.bf16.msra.mxu1 %v323_v17 }
  0x2e   :  { %144 = vmatmul.bf16.vlgmr.msra.gmra.mxu0 %v67_v14 }
  0xab   :  { %v145_v19 = vpop.f32.mrf.mxu0 }
  0xac   :  { %v146_v20 = vadd.f32 %v337_v18, %v145_v19 }
  0xae   :  { %339 = vtanh.f32 %v146_v20 }
  0xb3   :  { %v147_v21 = vpop.f32.mrf.mxu0 }
  0xb4   :  { %v340_v22 = vpop.eup %339 }
  0xb5   :  { %v150_v23 = vpack.c.bf16 %v340_v22, %v340_v22 }
  0xb7   :  { %227 = vmatmul.bf16.vlgmr.msra.gmra.mxu1 %v150_v23 }
 0x134   :  { %v228_v25 = vpop.f32.mrf.mxu1 }
 0x135   :  { %v229_v26 = vadd.f32 %v338_v24, %v228_v25 }
 0x137   :  { %232 = vst [vmem:[#allocation8] sm:$0xff] %v229_v26 }
 0x138   :  { %243 = dma.vmem_to_hbm [thread:$0]  %s239_s12, 128, %s241_s15, [#allocation4]  }
 0x13c   :  { %v230_v27 = vpop.f32.mrf.mxu1 }
 0x13d   :  { %441 = dma.done.wait [#allocation4], 128  }
 0x13e   :  { %442 = vsyncadd [#allocation4], 4294967168 }
 0x13f   :  { %248 = vsyncpa [#allocation3], 1 }
 0x140   :  { %249 = vsyncpa [#allocation6], 1 }
 0x141   :  { %250 = vsyncpa [#allocation4], 1 }

// kernel: tpu_custom_call.1
= control target key start
LH: loop header
LB: loop body
LE: loop exit
PB: predicated region body
PF: predicated region fallthrough
CT: control target
= control target key end

     0   :  { %10 = vsyncpa [#allocation3], 0  ;;  %s497_s0 = inlined_call_operand.hbm [shape: f32[8,128], index: 0, kind: input, shape index: {}]   ;;  %s498_s1 = inlined_call_operand.hbm [shape: bf16[128,128], index: 1, kind: input, shape index: {}]   ;;  %s499_s2 = inlined_call_operand.vmem [shape: f32[1,128], index: 2, kind: input, shape index: {}]   ;;  %s500_s3 = inlined_call_operand.hbm [shape: bf16[128,128], index: 3, kind: input, shape index: {}]   ;;  %s501_s4 = inlined_call_operand.vmem [shape: f32[1,128], index: 4, kind: input, shape index: {}]   ;;  %s502_s5 = inlined_call_operand.hbm [shape: f32[8,128], index: 5, kind: output, shape index: {}]  }
   0x1   :  { %11 = vsyncpa [#allocation6], 0  ;;  %s28_s20 = sshll.u32 %s498_s1, 4  ;;  %s29_s20 = int_to_ptr.hbm [resolvable:$true] %s28_s20 }
   0x2   :  { %12 = vsyncpa [#allocation4], 0  ;;  %s443_s21 = smov [#allocation5]   ;;  %s18_s25 = sshll.u32 %s497_s0, 4  ;;  %s19_s25 = int_to_ptr.hbm [resolvable:$true] %s18_s25 }
   0x3   :  { %s30_s22 = sshll.u32 %s443_s21, 4  ;;  %s444_s26 = smov 64   ;;  %s31_s22 = int_to_ptr.vmem [resolvable:$true] %s30_s22 }
   0x4   :  { %s445_s27 = smov 4   ;;  %s446_s28 = smov [#allocation2]  }
   0x5   :  { %36 = dma.hbm_to_vmem [thread:$0]  %s29_s20, 1024, %s31_s22, [#allocation6], %s444_s26, %s444_s26, %s445_s27  }
   0x6   :  { %s20_s29 = sshll.u32 %s446_s28, 4  ;;  %s43_s7 = sshll.u32 %s500_s3, 4  ;;  %s21_s29 = int_to_ptr.vmem [resolvable:$true] %s20_s29  ;;  %s44_s7 = int_to_ptr.hbm [resolvable:$true] %s43_s7 }
   0x7   :  { %23 = dma.hbm_to_vmem [thread:$0]  %s19_s25, 128, %s21_s29, [#allocation3]  }
   0x8   :  { %s447_s1 = smov [#allocation7]  }
   0x9   :  { %s45_s8 = sshll.u32 %s447_s1, 4  ;;  %s46_s8 = int_to_ptr.vmem [resolvable:$true] %s45_s8 }
   0xa   :  { %51 = dma.hbm_to_vmem [thread:$0]  %s44_s7, 1024, %s46_s8, [#allocation6], %s444_s26, %s444_s26, %s445_s27  }
   0xb   :  { %437 = dma.done.wait [#allocation3], 128  }
   0xc   :  { %438 = vsyncadd [#allocation3], 4294967168 }
   0xd   :  { %439 = dma.done.wait [#allocation6], 2048  }
   0xe   :  { %440 = vsyncadd [#allocation6], 4294965248  ;;  %v322_v0 = vld [vmem:[#allocation5 + $0x38] sm:$0xff]  ;;  %v321_v1 = vld [vmem:[#allocation5 + $0x30] sm:$0xff]  ;;  %s448_s11 = smov [#allocation8]   ;;  %s240_s15 = sshll.u32 %s502_s5, 4  ;;  %s241_s15 = int_to_ptr.hbm [resolvable:$true] %s240_s15 }
   0xf   :  { %136 = vmatpush.bf16.msra.mxu0 %v322_v0  ;;  %v330_v2 = vld [vmem:[#allocation7 + $0x38] sm:$0xff]  ;;  %v329_v3 = vld [vmem:[#allocation7 + $0x30] sm:$0xff]  ;;  %v320_v4 = vld [vmem:[#allocation5 + $0x28] sm:$0xff]  ;;  %s238_s12 = sshll.u32 %s448_s11, 4  ;;  %s239_s12 = int_to_ptr.vmem [resolvable:$true] %s238_s12 }
  0x10   :  { %219 = vmatpush.bf16.msra.mxu1 %v330_v2  ;;  %v328_v5 = vld [vmem:[#allocation7 + $0x28] sm:$0xff]  ;;  %v319_v6 = vld [vmem:[#allocation5 + $0x20] sm:$0xff]  ;;  %v318_v8 = vld [vmem:[#allocation5 + $0x18] sm:$0xff] }
  0x11   :  { %v327_v7 = vld [vmem:[#allocation7 + $0x20] sm:$0xff]  ;;  %v326_v9 = vld [vmem:[#allocation7 + $0x18] sm:$0xff]  ;;  %v317_v10 = vld [vmem:[#allocation5 + $0x10] sm:$0xff] }
  0x12   :  { %v316_v11 = vld [vmem:[#allocation5 + $0x8] sm:$0xff]  ;;  %v315_v12 = vld [vmem:[#allocation5] sm:$0xff]  ;;  %v66_v13 = vld [vmem:[#allocation2] sm:$0xff] }
  0x13   :  { %137 = vmatpush.bf16.msra.mxu0 %v321_v1  ;;  %v67_v14 = vpack.c.bf16 %v66_v13, %v66_v13  ;;  %v325_v15 = vld [vmem:[#allocation7 + $0x10] sm:$0xff]  ;;  %v324_v16 = vld [vmem:[#allocation7 + $0x8] sm:$0xff]  ;;  %v323_v17 = vld [vmem:[#allocation7] sm:$0xff] }
  0x14   :  { %220 = vmatpush.bf16.msra.mxu1 %v329_v3  ;;  %v337_v18 = vld [vmem:[%s499_s2] ss:$0 sm:$0xff] }
  0x15   :  { %v338_v24 = vld [vmem:[%s501_s4] ss:$0 sm:$0xff] }
  0x17   :  { %138 = vmatpush.bf16.msra.mxu0 %v320_v4 }
  0x18   :  { %221 = vmatpush.bf16.msra.mxu1 %v328_v5 }
  0x1b   :  { %139 = vmatpush.bf16.msra.mxu0 %v319_v6 }
  0x1c   :  { %222 = vmatpush.bf16.msra.mxu1 %v327_v7 }
  0x1f   :  { %140 = vmatpush.bf16.msra.mxu0 %v318_v8 }
  0x20   :  { %223 = vmatpush.bf16.msra.mxu1 %v326_v9 }
  0x23   :  { %141 = vmatpush.bf16.msra.mxu0 %v317_v10 }
  0x24   :  { %224 = vmatpush.bf16.msra.mxu1 %v325_v15 }
  0x27   :  { %142 = vmatpush.bf16.msra.mxu0 %v316_v11 }
  0x28   :  { %225 = vmatpush.bf16.msra.mxu1 %v324_v16 }
  0x2b   :  { %143 = vmatpush.bf16.msra.mxu0 %v315_v12 }
  0x2c   :  { %226 = vmatpush.bf16.msra.mxu1 %v323_v17 }
  0x2e   :  { %144 = vmatmul.bf16.vlgmr.msra.gmra.mxu0 %v67_v14 }
  0xab   :  { %v145_v19 = vpop.f32.mrf.mxu0 }
  0xac   :  { %v146_v20 = vadd.f32 %v337_v18, %v145_v19 }
  0xae   :  { %339 = vtanh.f32 %v146_v20 }
  0xb3   :  { %v147_v21 = vpop.f32.mrf.mxu0 }
  0xb4   :  { %v340_v22 = vpop.eup %339 }
  0xb5   :  { %v150_v23 = vpack.c.bf16 %v340_v22, %v340_v22 }
  0xb7   :  { %227 = vmatmul.bf16.vlgmr.msra.gmra.mxu1 %v150_v23 }
 0x134   :  { %v228_v25 = vpop.f32.mrf.mxu1 }
 0x135   :  { %v229_v26 = vadd.f32 %v338_v24, %v228_v25 }
 0x137   :  { %232 = vst [vmem:[#allocation8] sm:$0xff] %v229_v26 }
 0x138   :  { %243 = dma.vmem_to_hbm [thread:$0]  %s239_s12, 128, %s241_s15, [#allocation4]  }
 0x13c   :  { %v230_v27 = vpop.f32.mrf.mxu1 }
 0x13d   :  { %441 = dma.done.wait [#allocation4], 128  }
 0x13e   :  { %442 = vsyncadd [#allocation4], 4294967168 }
 0x13f   :  { %248 = vsyncpa [#allocation3], 1 }
 0x140   :  { %249 = vsyncpa [#allocation6], 1 }
 0x141   :  { %250 = vsyncpa [#allocation4], 1 }

</bundles_post_ra>
